<compile_context>
chip_gen: v6e
topology: v6e:2x2x1
jax: 0.10.0
libtpu: 0.0.40
codegen_flags: <defaults>
</compile_context>

<pallas_src>
import functools

import jax
import jax.numpy as jnp
from jax.experimental import pallas as pl
from jax.experimental.pallas import tpu as pltpu


# ----------------------------------------------------------------------------
# Pallas kernel: one M-tile of the gate-folded mode transform.
#   out_tile = x_tile @ W_comb + b_comb
# ----------------------------------------------------------------------------
def _mode_matmul_kernel(x_ref, w_ref, b_ref, o_ref):
    # TODO(synk): optionally cast x/w to bfloat16 for the MXU (biggest win on
    # v5e) — kept in f32 here to match the PyTorch module bit-for-bit-ish.
    acc = jnp.dot(x_ref[...], w_ref[...], preferred_element_type=jnp.float32)
    o_ref[...] = (acc + b_ref[...]).astype(o_ref.dtype)


def _mode_matmul(x_flat, w_comb, b_comb, *, tile_m=512):
    """x_flat: [M, din] f32, w_comb: [din, dout], b_comb: [1, dout]."""
    M, din = x_flat.shape
    dout = w_comb.shape[1]

    # Tile over M.  If the slab is smaller than the target tile, use a single
    # full-extent block (block == full dim is always legal).  tile_m is a
    # multiple of 8 so the (8, 128) sublane constraint holds for larger M.
    tm = M if M <= tile_m else tile_m
    grid = (pl.cdiv(M, tm),)

    cost = pl.CostEstimate(
        flops=2 * M * din * dout,
        transcendentals=0,
        bytes_accessed=4 * (M * din + din * dout + dout + M * dout),
    )

    # TODO(synk): dout of 8/16/32 is lane-sparse (<128); a transposed
    # [dout, M] output orientation (or packing several modes) would make the
    # stores lane-dense, at the cost of extra wrapper transposes.
    return pl.pallas_call(
        _mode_matmul_kernel,
        out_shape=jax.ShapeDtypeStruct((M, dout), jnp.float32),
        grid=grid,
        in_specs=[
            pl.BlockSpec((tm, din), lambda i: (i, 0)),      # streamed X tile
            pl.BlockSpec((din, dout), lambda i: (0, 0)),    # resident weights
            pl.BlockSpec((1, dout), lambda i: (0, 0)),      # resident bias
        ],
        out_specs=pl.BlockSpec((tm, dout), lambda i: (i, 0)),
        compiler_params=pltpu.CompilerParams(
            dimension_semantics=("parallel",),              # megacore on v7x
            vmem_limit_bytes=32 * 1024 * 1024,              # safe on v5e/v6e/v7x
        ),
        cost_estimate=cost,
    )(x_flat, w_comb, b_comb)


# ----------------------------------------------------------------------------
# Parameter construction (deterministic, mimics nn.Linear uniform init).
# ----------------------------------------------------------------------------
def init_params(key, input_dims, hidden_size, gating_hidden_dim=16):
    params = []
    for din, dout in zip(input_dims, hidden_size):
        key, k1, k2, k3, k4, k5, k6, k7, k8 = jax.random.split(key, 9)
        s_a = 1.0 / jnp.sqrt(din)
        w = jax.random.uniform(k1, (din, dout), jnp.float32, -s_a, s_a)
        b = jax.random.uniform(k2, (1, dout), jnp.float32, -s_a, s_a)
        gw1 = jax.random.uniform(k3, (din, gating_hidden_dim), jnp.float32, -s_a, s_a)
        gb1 = jax.random.uniform(k4, (1, gating_hidden_dim), jnp.float32, -s_a, s_a)
        s_g = 1.0 / jnp.sqrt(gating_hidden_dim)
        gw2 = jax.random.uniform(k5, (gating_hidden_dim, 1), jnp.float32, -s_g, s_g)
        gb2 = jax.random.uniform(k6, (1, 1), jnp.float32, -s_g, s_g)
        if din != dout:
            wi = jax.random.uniform(k7, (din, dout), jnp.float32, -s_a, s_a)
            bi = jax.random.uniform(k8, (1, dout), jnp.float32, -s_a, s_a)
        else:
            wi = jnp.eye(din, dtype=jnp.float32)       # nn.Identity equivalent
            bi = jnp.zeros((1, dout), jnp.float32)
        params.append((w, b, gw1, gb1, gw2, gb2, wi, bi))
    return params


# ----------------------------------------------------------------------------
# Forward pass.  Gate MLP + weight folding + transpose glue in JAX (tiny /
# layout plumbing); the big streaming matmul per mode runs in the Pallas
# kernel, tiled and pipelined over M.
# ----------------------------------------------------------------------------
def ndlinear_gated_forward(x, params):
    num_transforms = len(params)
    for i in range(num_transforms):
        axis = i + 1                                   # transform_outer=True
        w, b, gw1, gb1, gw2, gb2, wi, bi = params[i]

        # Global gate: sigmoid(MLP(mean of X over all axes except the mode
        # axis)).  This equals the row-mean of the flattened slab, so it can
        # be computed without the swapaxes/reshape and stays global even
        # though the kernel tiles over M.
        reduce_axes = tuple(a for a in range(x.ndim) if a != axis)
        x_mean = jnp.mean(x, axis=reduce_axes)[None, :]                  # [1, din]
        h = jnp.maximum(x_mean @ gw1 + gb1, 0.0)
        gate = jax.nn.sigmoid(h @ gw2 + gb2)                             # [1, 1]
        # TODO(synk): gating_mode='hard' would pick W/Wi with jnp.where(gate>0.5,...).

        # Fold the scalar gate into the weights: one matmul instead of two.
        w_comb = gate * w + (1.0 - gate) * wi
        b_comb = gate * b + (1.0 - gate) * bi

        # Mode axis -> last (lane) axis; no-op for the last mode.
        # TODO(synk): fold this permutation into the BlockSpec index_map over
        # the original N-D array to avoid the extra HBM transpose passes.
        need_swap = axis != num_transforms
        x_t = jnp.swapaxes(x, axis, num_transforms) if need_swap else x
        lead_shape = x_t.shape[:-1]
        x_flat = x_t.reshape(-1, x_t.shape[-1])

        out_flat = _mode_matmul(x_flat, w_comb, b_comb)

        x_t = out_flat.reshape(*lead_shape, out_flat.shape[-1])
        x = jnp.swapaxes(x_t, axis, num_transforms) if need_swap else x_t
    return x


# Pure-JAX reference in the ORIGINAL (un-folded) form of the module, used to
# verify that the gate-folded Pallas path preserves the semantics.
def _reference_forward(x, params):
    num_transforms = len(params)
    for i in range(num_transforms):
        axis = i + 1
        w, b, gw1, gb1, gw2, gb2, wi, bi = params[i]
        x_t = jnp.swapaxes(x, axis, num_transforms)
        lead_shape = x_t.shape[:-1]
        x_flat = x_t.reshape(-1, x_t.shape[-1])
        xt = x_flat @ w + b
        x_mean = jnp.mean(x_flat, axis=0, keepdims=True)
        gate = jax.nn.sigmoid(jnp.maximum(x_mean @ gw1 + gb1, 0.0) @ gw2 + gb2)
        xi = x_flat @ wi + bi
        out_flat = gate * xt + (1.0 - gate) * xi
        x_t = out_flat.reshape(*lead_shape, out_flat.shape[-1])
        x = jnp.swapaxes(x_t, axis, num_transforms)
    return x


if __name__ == "__main__":
    input_dims = (4, 16, 16)
    hidden_size = (8, 16, 32)
    batch = 2

    key = jax.random.PRNGKey(0)
    key, xkey = jax.random.split(key)
    x = jax.random.normal(xkey, (batch,) + input_dims, dtype=jnp.float32)
    params = init_params(key, input_dims, hidden_size, gating_hidden_dim=16)

    fwd = jax.jit(functools.partial(ndlinear_gated_forward, params=params))
    out = fwd(x)
    out = jax.block_until_ready(out)

    assert out.shape == (batch,) + hidden_size, out.shape
    ref = _reference_forward(x, params)
    assert jnp.allclose(out, ref, rtol=1e-4, atol=1e-4), "mismatch vs reference"

    print("KERNEL_OK")
</pallas_src>

<mosaic_0001>
module attributes {stable_mosaic.version = 11 : i64} {
  func.func @_mode_matmul_kernel(%arg0: i32, %arg1: memref<512x4xf32, #tpu.memory_space<vmem>>, %arg2: memref<4x8xf32, #tpu.memory_space<vmem>>, %arg3: memref<1x8xf32, #tpu.memory_space<vmem>>, %arg4: memref<512x8xf32, #tpu.memory_space<vmem>>) attributes {dimension_semantics = [#tpu.dimension_semantics<parallel>], iteration_bounds = array<i64: 1>, scalar_prefetch = 0 : i64, scratch_operands = 0 : i64, tpu.core_type = #tpu.core_type<tc>, window_params = [{transform_indices = @transform_0, window_bounds = array<i64: 512, 4>}, {pipeline_mode = #tpu.pipeline_mode<synchronous>, transform_indices = @transform_1, window_bounds = array<i64: 4, 8>}, {pipeline_mode = #tpu.pipeline_mode<synchronous>, transform_indices = @transform_2, window_bounds = array<i64: 1, 8>}, {transform_indices = @transform_3, window_bounds = array<i64: 512, 8>}]} {
    %c0 = arith.constant 0 : index
    %c0_0 = arith.constant 0 : index
    %0 = vector.load %arg1[%c0, %c0_0] : memref<512x4xf32, #tpu.memory_space<vmem>>, vector<512x4xf32>
    %c0_1 = arith.constant 0 : index
    %c0_2 = arith.constant 0 : index
    %1 = vector.load %arg2[%c0_1, %c0_2] : memref<4x8xf32, #tpu.memory_space<vmem>>, vector<4x8xf32>
    %cst = arith.constant dense<0.000000e+00> : vector<512x8xf32>
    %2 = tpu.matmul %0, %1, %cst {dimension_numbers = #tpu.dot_dimension_numbers<[1], [0], [0], [1], [0, 0, 1, 1], [], []>} : vector<512x4xf32>, vector<4x8xf32>, vector<512x8xf32> -> vector<512x8xf32>
    %c0_3 = arith.constant 0 : index
    %c0_4 = arith.constant 0 : index
    %3 = vector.load %arg3[%c0_3, %c0_4] : memref<1x8xf32, #tpu.memory_space<vmem>>, vector<1x8xf32>
    %4 = vector.broadcast %3 : vector<1x8xf32> to vector<512x8xf32>
    %5 = arith.addf %2, %4 : vector<512x8xf32>
    %c0_5 = arith.constant 0 : index
    %c0_6 = arith.constant 0 : index
    %6 = vector.load %arg4[%c0_5, %c0_6] : memref<512x8xf32, #tpu.memory_space<vmem>>, vector<512x8xf32>
    tpu.vector_store %arg4[%c0_5, %c0_6], %5 {strides = array<i32>} : memref<512x8xf32, #tpu.memory_space<vmem>>, vector<512x8xf32>,
    return
  }
  func.func @transform_0(%arg0: i32) -> (i32, i32) {
    %c0_i32 = arith.constant 0 : i32
    %c0_i32_0 = arith.constant 0 : i32
    return %arg0, %c0_i32 : i32, i32
  }
  func.func @transform_1(%arg0: i32) -> (i32, i32) {
    %c0_i32 = arith.constant 0 : i32
    %c0_i32_0 = arith.constant 0 : i32
    %c0_i32_1 = arith.constant 0 : i32
    return %c0_i32, %c0_i32_0 : i32, i32
  }
  func.func @transform_2(%arg0: i32) -> (i32, i32) {
    %c0_i32 = arith.constant 0 : i32
    %c0_i32_0 = arith.constant 0 : i32
    %c0_i32_1 = arith.constant 0 : i32
    return %c0_i32, %c0_i32_0 : i32, i32
  }
  func.func @transform_3(%arg0: i32) -> (i32, i32) {
    %c0_i32 = arith.constant 0 : i32
    %c0_i32_0 = arith.constant 0 : i32
    return %arg0, %c0_i32 : i32, i32
  }
}

module attributes {stable_mosaic.version = 11 : i64} {
  func.func @_mode_matmul_kernel(%arg0: i32, %arg1: memref<256x16xf32, #tpu.memory_space<vmem>>, %arg2: memref<16x16xf32, #tpu.memory_space<vmem>>, %arg3: memref<1x16xf32, #tpu.memory_space<vmem>>, %arg4: memref<256x16xf32, #tpu.memory_space<vmem>>) attributes {dimension_semantics = [#tpu.dimension_semantics<parallel>], iteration_bounds = array<i64: 1>, scalar_prefetch = 0 : i64, scratch_operands = 0 : i64, tpu.core_type = #tpu.core_type<tc>, window_params = [{transform_indices = @transform_0, window_bounds = array<i64: 256, 16>}, {pipeline_mode = #tpu.pipeline_mode<synchronous>, transform_indices = @transform_1, window_bounds = array<i64: 16, 16>}, {pipeline_mode = #tpu.pipeline_mode<synchronous>, transform_indices = @transform_2, window_bounds = array<i64: 1, 16>}, {transform_indices = @transform_3, window_bounds = array<i64: 256, 16>}]} {
    %c0 = arith.constant 0 : index
    %c0_0 = arith.constant 0 : index
    %0 = vector.load %arg1[%c0, %c0_0] : memref<256x16xf32, #tpu.memory_space<vmem>>, vector<256x16xf32>
    %c0_1 = arith.constant 0 : index
    %c0_2 = arith.constant 0 : index
    %1 = vector.load %arg2[%c0_1, %c0_2] : memref<16x16xf32, #tpu.memory_space<vmem>>, vector<16x16xf32>
    %cst = arith.constant dense<0.000000e+00> : vector<256x16xf32>
    %2 = tpu.matmul %0, %1, %cst {dimension_numbers = #tpu.dot_dimension_numbers<[1], [0], [0], [1], [0, 0, 1, 1], [], []>} : vector<256x16xf32>, vector<16x16xf32>, vector<256x16xf32> -> vector<256x16xf32>
    %c0_3 = arith.constant 0 : index
    %c0_4 = arith.constant 0 : index
    %3 = vector.load %arg3[%c0_3, %c0_4] : memref<1x16xf32, #tpu.memory_space<vmem>>, vector<1x16xf32>
    %4 = vector.broadcast %3 : vector<1x16xf32> to vector<256x16xf32>
    %5 = arith.addf %2, %4 : vector<256x16xf32>
    %c0_5 = arith.constant 0 : index
    %c0_6 = arith.constant 0 : index
    %6 = vector.load %arg4[%c0_5, %c0_6] : memref<256x16xf32, #tpu.memory_space<vmem>>, vector<256x16xf32>
    tpu.vector_store %arg4[%c0_5, %c0_6], %5 {strides = array<i32>} : memref<256x16xf32, #tpu.memory_space<vmem>>, vector<256x16xf32>,
    return
  }
  func.func @transform_0(%arg0: i32) -> (i32, i32) {
    %c0_i32 = arith.constant 0 : i32
    %c0_i32_0 = arith.constant 0 : i32
    return %arg0, %c0_i32 : i32, i32
  }
  func.func @transform_1(%arg0: i32) -> (i32, i32) {
    %c0_i32 = arith.constant 0 : i32
    %c0_i32_0 = arith.constant 0 : i32
    %c0_i32_1 = arith.constant 0 : i32
    return %c0_i32, %c0_i32_0 : i32, i32
  }
  func.func @transform_2(%arg0: i32) -> (i32, i32) {
    %c0_i32 = arith.constant 0 : i32
    %c0_i32_0 = arith.constant 0 : i32
    %c0_i32_1 = arith.constant 0 : i32
    return %c0_i32, %c0_i32_0 : i32, i32
  }
  func.func @transform_3(%arg0: i32) -> (i32, i32) {
    %c0_i32 = arith.constant 0 : i32
    %c0_i32_0 = arith.constant 0 : i32
    return %arg0, %c0_i32 : i32, i32
  }
}

module attributes {stable_mosaic.version = 11 : i64} {
  func.func @_mode_matmul_kernel(%arg0: i32, %arg1: memref<256x16xf32, #tpu.memory_space<vmem>>, %arg2: memref<16x32xf32, #tpu.memory_space<vmem>>, %arg3: memref<1x32xf32, #tpu.memory_space<vmem>>, %arg4: memref<256x32xf32, #tpu.memory_space<vmem>>) attributes {dimension_semantics = [#tpu.dimension_semantics<parallel>], iteration_bounds = array<i64: 1>, scalar_prefetch = 0 : i64, scratch_operands = 0 : i64, tpu.core_type = #tpu.core_type<tc>, window_params = [{transform_indices = @transform_0, window_bounds = array<i64: 256, 16>}, {pipeline_mode = #tpu.pipeline_mode<synchronous>, transform_indices = @transform_1, window_bounds = array<i64: 16, 32>}, {pipeline_mode = #tpu.pipeline_mode<synchronous>, transform_indices = @transform_2, window_bounds = array<i64: 1, 32>}, {transform_indices = @transform_3, window_bounds = array<i64: 256, 32>}]} {
    %c0 = arith.constant 0 : index
    %c0_0 = arith.constant 0 : index
    %0 = vector.load %arg1[%c0, %c0_0] : memref<256x16xf32, #tpu.memory_space<vmem>>, vector<256x16xf32>
    %c0_1 = arith.constant 0 : index
    %c0_2 = arith.constant 0 : index
    %1 = vector.load %arg2[%c0_1, %c0_2] : memref<16x32xf32, #tpu.memory_space<vmem>>, vector<16x32xf32>
    %cst = arith.constant dense<0.000000e+00> : vector<256x32xf32>
    %2 = tpu.matmul %0, %1, %cst {dimension_numbers = #tpu.dot_dimension_numbers<[1], [0], [0], [1], [0, 0, 1, 1], [], []>} : vector<256x16xf32>, vector<16x32xf32>, vector<256x32xf32> -> vector<256x32xf32>
    %c0_3 = arith.constant 0 : index
    %c0_4 = arith.constant 0 : index
    %3 = vector.load %arg3[%c0_3, %c0_4] : memref<1x32xf32, #tpu.memory_space<vmem>>, vector<1x32xf32>
    %4 = vector.broadcast %3 : vector<1x32xf32> to vector<256x32xf32>
    %5 = arith.addf %2, %4 : vector<256x32xf32>
    %c0_5 = arith.constant 0 : index
    %c0_6 = arith.constant 0 : index
    %6 = vector.load %arg4[%c0_5, %c0_6] : memref<256x32xf32, #tpu.memory_space<vmem>>, vector<256x32xf32>
    tpu.vector_store %arg4[%c0_5, %c0_6], %5 {strides = array<i32>} : memref<256x32xf32, #tpu.memory_space<vmem>>, vector<256x32xf32>,
    return
  }
  func.func @transform_0(%arg0: i32) -> (i32, i32) {
    %c0_i32 = arith.constant 0 : i32
    %c0_i32_0 = arith.constant 0 : i32
    return %arg0, %c0_i32 : i32, i32
  }
  func.func @transform_1(%arg0: i32) -> (i32, i32) {
    %c0_i32 = arith.constant 0 : i32
    %c0_i32_0 = arith.constant 0 : i32
    %c0_i32_1 = arith.constant 0 : i32
    return %c0_i32, %c0_i32_0 : i32, i32
  }
  func.func @transform_2(%arg0: i32) -> (i32, i32) {
    %c0_i32 = arith.constant 0 : i32
    %c0_i32_0 = arith.constant 0 : i32
    %c0_i32_1 = arith.constant 0 : i32
    return %c0_i32, %c0_i32_0 : i32, i32
  }
  func.func @transform_3(%arg0: i32) -> (i32, i32) {
    %c0_i32 = arith.constant 0 : i32
    %c0_i32_0 = arith.constant 0 : i32
    return %arg0, %c0_i32 : i32, i32
  }
}

</mosaic_0001>

<bundles_post_ra>
// kernel: ndlinear_gated_forward.4
= control target key start
LH: loop header
LB: loop body
LE: loop exit
PB: predicated region body
PF: predicated region fallthrough
CT: control target
= control target key end

     0   :  { %vm55_vm0 = vcmask 130048   ;;  %s855_s1 = inlined_call_operand.vmem [shape: f32[16,16], index: 1, kind: input, shape index: {}]   ;;  %s856_s0 = inlined_call_operand.vmem [shape: f32[256,16], index: 0, kind: input, shape index: {}]   ;;  %s857_s2 = inlined_call_operand.vmem [shape: f32[1,16], index: 2, kind: input, shape index: {}]   ;;  %s858_s3 = inlined_call_operand.vmem [shape: f32[256,16], index: 3, kind: output, shape index: {}]  }
   0x1   :  { %v47_v0 = vld [vmem:[%s855_s1 + $0x8] sm:$0xff]  ;;  %v46_v1 = vld [vmem:[%s855_s1] sm:$0xff]  ;;  %v16_v6 = vld [vmem:[%s856_s0 + $0x10] sm:$0xff] }
   0x2   :  { %480 = vmatprep.subr.mxu0 %v47_v0  ;;  %532 = vmatprep.subr.mxu1 %v47_v0  ;;  %v14_v2 = vld [vmem:[%s856_s0] sm:$0xff]  ;;  %v15_v4 = vld [vmem:[%s856_s0 + $0x8] sm:$0xff]  ;;  %v32_v7 = vld [vmem:[%s856_s0 + $0x90] sm:$0xff] }
   0x3   :  { %481 = vmatpush3.msra.mxu0 %v47_v0  ;;  %534 = vmatpush3.msra.mxu1 %v47_v0  ;;  %v30_v3 = vld [vmem:[%s856_s0 + $0x80] sm:$0xff]  ;;  %v31_v5 = vld [vmem:[%s856_s0 + $0x88] sm:$0xff]  ;;  %v17_v8 = vld [vmem:[%s856_s0 + $0x18] sm:$0xff] }
   0x4   :  { %482 = vmatprep.subr.mxu0 %v46_v1  ;;  %533 = vmatprep.subr.mxu1 %v46_v1  ;;  %v33_v9 = vld [vmem:[%s856_s0 + $0x98] sm:$0xff]  ;;  %v18_v10 = vld [vmem:[%s856_s0 + $0x20] sm:$0xff]  ;;  %v19_v12 = vld [vmem:[%s856_s0 + $0x28] sm:$0xff] }
   0x5   :  { %483 = vmatpush3.msra.mxu0 %v46_v1  ;;  %535 = vmatpush3.msra.mxu1 %v46_v1  ;;  %v34_v11 = vld [vmem:[%s856_s0 + $0xa0] sm:$0xff]  ;;  %v35_v13 = vld [vmem:[%s856_s0 + $0xa8] sm:$0xff]  ;;  %v20_v14 = vld [vmem:[%s856_s0 + $0x30] sm:$0xff] }
   0x6   :  { %484 = vmatprep.mubr.msk.f32.mxu0 %vm55_vm0, %v14_v2  ;;  %508 = vmatprep.mubr.msk.f32.mxu1 %vm55_vm0, %v30_v3  ;;  %v36_v15 = vld [vmem:[%s856_s0 + $0xb0] sm:$0xff]  ;;  %v21_v16 = vld [vmem:[%s856_s0 + $0x38] sm:$0xff]  ;;  %v22_v18 = vld [vmem:[%s856_s0 + $0x40] sm:$0xff] }
   0x7   :  { %485 = vmatmul.mubr.msk.f32.vlgmr.msra.gmra.mxu0 %vm55_vm0, %v15_v4  ;;  %509 = vmatmul.mubr.msk.f32.vlgmr.msra.gmra.mxu1 %vm55_vm0, %v31_v5  ;;  %v37_v17 = vld [vmem:[%s856_s0 + $0xb8] sm:$0xff]  ;;  %v38_v19 = vld [vmem:[%s856_s0 + $0xc0] sm:$0xff]  ;;  %v23_v20 = vld [vmem:[%s856_s0 + $0x48] sm:$0xff] }
   0x8   :  { %487 = vmatprep.mubr.msk.f32.mxu0 %vm55_vm0, %v16_v6  ;;  %511 = vmatprep.mubr.msk.f32.mxu1 %vm55_vm0, %v32_v7  ;;  %v39_v21 = vld [vmem:[%s856_s0 + $0xc8] sm:$0xff]  ;;  %v24_v22 = vld [vmem:[%s856_s0 + $0x50] sm:$0xff]  ;;  %v25_v24 = vld [vmem:[%s856_s0 + $0x58] sm:$0xff] }
   0x9   :  { %v40_v23 = vld [vmem:[%s856_s0 + $0xd0] sm:$0xff]  ;;  %v41_v25 = vld [vmem:[%s856_s0 + $0xd8] sm:$0xff]  ;;  %v26_v26 = vld [vmem:[%s856_s0 + $0x60] sm:$0xff] }
   0xa   :  { %v42_v27 = vld [vmem:[%s856_s0 + $0xe0] sm:$0xff]  ;;  %v27_v28 = vld [vmem:[%s856_s0 + $0x68] sm:$0xff]  ;;  %v28_v30 = vld [vmem:[%s856_s0 + $0x70] sm:$0xff] }
   0xb   :  { %488 = vmatmul.mubr.msk.f32.gmra.mxu0 %vm55_vm0, %v17_v8  ;;  %512 = vmatmul.mubr.msk.f32.gmra.mxu1 %vm55_vm0, %v33_v9  ;;  %v43_v29 = vld [vmem:[%s856_s0 + $0xe8] sm:$0xff]  ;;  %v44_v31 = vld [vmem:[%s856_s0 + $0xf0] sm:$0xff]  ;;  %v29_v32 = vld [vmem:[%s856_s0 + $0x78] sm:$0xff] }
   0xc   :  { %490 = vmatprep.mubr.msk.f32.mxu0 %vm55_vm0, %v18_v10  ;;  %514 = vmatprep.mubr.msk.f32.mxu1 %vm55_vm0, %v34_v11  ;;  %v45_v33 = vld [vmem:[%s856_s0 + $0xf8] sm:$0xff]  ;;  %v693_v34 = vld [vmem:[%s857_s2] ss:$0 sm:$0xff] }
   0xf   :  { %491 = vmatmul.mubr.msk.f32.gmra.mxu0 %vm55_vm0, %v19_v12  ;;  %515 = vmatmul.mubr.msk.f32.gmra.mxu1 %vm55_vm0, %v35_v13 }
  0x10   :  { %493 = vmatprep.mubr.msk.f32.mxu0 %vm55_vm0, %v20_v14  ;;  %517 = vmatprep.mubr.msk.f32.mxu1 %vm55_vm0, %v36_v15 }
  0x13   :  { %494 = vmatmul.mubr.msk.f32.gmra.mxu0 %vm55_vm0, %v21_v16  ;;  %518 = vmatmul.mubr.msk.f32.gmra.mxu1 %vm55_vm0, %v37_v17 }
  0x14   :  { %496 = vmatprep.mubr.msk.f32.mxu0 %vm55_vm0, %v22_v18  ;;  %520 = vmatprep.mubr.msk.f32.mxu1 %vm55_vm0, %v38_v19 }
  0x17   :  { %497 = vmatmul.mubr.msk.f32.gmra.mxu0 %vm55_vm0, %v23_v20  ;;  %521 = vmatmul.mubr.msk.f32.gmra.mxu1 %vm55_vm0, %v39_v21 }
  0x18   :  { %499 = vmatprep.mubr.msk.f32.mxu0 %vm55_vm0, %v24_v22  ;;  %523 = vmatprep.mubr.msk.f32.mxu1 %vm55_vm0, %v40_v23 }
  0x1b   :  { %500 = vmatmul.mubr.msk.f32.gmra.mxu0 %vm55_vm0, %v25_v24  ;;  %524 = vmatmul.mubr.msk.f32.gmra.mxu1 %vm55_vm0, %v41_v25 }
  0x1c   :  { %502 = vmatprep.mubr.msk.f32.mxu0 %vm55_vm0, %v26_v26  ;;  %526 = vmatprep.mubr.msk.f32.mxu1 %vm55_vm0, %v42_v27 }
  0x1f   :  { %503 = vmatmul.mubr.msk.f32.gmra.mxu0 %vm55_vm0, %v27_v28  ;;  %527 = vmatmul.mubr.msk.f32.gmra.mxu1 %vm55_vm0, %v43_v29 }
  0x20   :  { %505 = vmatprep.mubr.msk.f32.mxu0 %vm55_vm0, %v28_v30  ;;  %529 = vmatprep.mubr.msk.f32.mxu1 %vm55_vm0, %v44_v31 }
  0x23   :  { %506 = vmatmul.mubr.msk.f32.gmra.mxu0 %vm55_vm0, %v29_v32  ;;  %530 = vmatmul.mubr.msk.f32.gmra.mxu1 %vm55_vm0, %v45_v33 }
  0xc7   :  { %v486_v35 = vpop.f32.mrf.mxu0  ;;  %v510_v36 = vpop.f32.mrf.mxu1 }
  0xc8   :  { %v224_v37 = vadd.f32 %v486_v35, %v693_v34  ;;  %v304_v38 = vadd.f32 %v510_v36, %v693_v34 }
  0xc9   :  { %v218_v39 = vpop.f32.mrf.mxu0  ;;  %v298_v40 = vpop.f32.mrf.mxu1 }
  0xca   :  { %378 = vst.msk [vmem:[%s858_s3 + $0x8] sm:$0xff] %vm55_vm0, %v224_v37  ;;  %394 = vst.msk [vmem:[%s858_s3 + $0x88] sm:$0xff] %vm55_vm0, %v304_v38  ;;  %v219_v41 = vadd.f32 %v693_v34, %v218_v39  ;;  %v299_v42 = vadd.f32 %v693_v34, %v298_v40 }
  0xcb   :  { %v489_v43 = vpop.f32.mrf.mxu0  ;;  %v513_v44 = vpop.f32.mrf.mxu1 }
  0xcc   :  { %377 = vst.msk [vmem:[%s858_s3] sm:$0xff] %vm55_vm0, %v219_v41  ;;  %393 = vst.msk [vmem:[%s858_s3 + $0x80] sm:$0xff] %vm55_vm0, %v299_v42  ;;  %v234_v45 = vadd.f32 %v489_v43, %v693_v34  ;;  %v314_v46 = vadd.f32 %v513_v44, %v693_v34 }
  0xcd   :  { %v228_v47 = vpop.f32.mrf.mxu0  ;;  %v308_v48 = vpop.f32.mrf.mxu1 }
  0xce   :  { %380 = vst.msk [vmem:[%s858_s3 + $0x18] sm:$0xff] %vm55_vm0, %v234_v45  ;;  %396 = vst.msk [vmem:[%s858_s3 + $0x98] sm:$0xff] %vm55_vm0, %v314_v46  ;;  %v229_v49 = vadd.f32 %v693_v34, %v228_v47  ;;  %v309_v50 = vadd.f32 %v693_v34, %v308_v48 }
  0xcf   :  { %v492_v51 = vpop.f32.mrf.mxu0  ;;  %v516_v52 = vpop.f32.mrf.mxu1 }
  0xd0   :  { %379 = vst.msk [vmem:[%s858_s3 + $0x10] sm:$0xff] %vm55_vm0, %v229_v49  ;;  %395 = vst.msk [vmem:[%s858_s3 + $0x90] sm:$0xff] %vm55_vm0, %v309_v50  ;;  %v244_v53 = vadd.f32 %v492_v51, %v693_v34  ;;  %v324_v54 = vadd.f32 %v516_v52, %v693_v34 }
  0xd1   :  { %v238_v55 = vpop.f32.mrf.mxu0  ;;  %v318_v56 = vpop.f32.mrf.mxu1 }
  0xd2   :  { %382 = vst.msk [vmem:[%s858_s3 + $0x28] sm:$0xff] %vm55_vm0, %v244_v53  ;;  %398 = vst.msk [vmem:[%s858_s3 + $0xa8] sm:$0xff] %vm55_vm0, %v324_v54  ;;  %v239_v57 = vadd.f32 %v693_v34, %v238_v55  ;;  %v319_v58 = vadd.f32 %v693_v34, %v318_v56 }
  0xd3   :  { %v495_v59 = vpop.f32.mrf.mxu0  ;;  %v519_v60 = vpop.f32.mrf.mxu1 }
  0xd4   :  { %381 = vst.msk [vmem:[%s858_s3 + $0x20] sm:$0xff] %vm55_vm0, %v239_v57  ;;  %397 = vst.msk [vmem:[%s858_s3 + $0xa0] sm:$0xff] %vm55_vm0, %v319_v58  ;;  %v254_v61 = vadd.f32 %v495_v59, %v693_v34  ;;  %v334_v62 = vadd.f32 %v519_v60, %v693_v34 }
  0xd5   :  { %v248_v63 = vpop.f32.mrf.mxu0  ;;  %v328_v0 = vpop.f32.mrf.mxu1 }
  0xd6   :  { %384 = vst.msk [vmem:[%s858_s3 + $0x38] sm:$0xff] %vm55_vm0, %v254_v61  ;;  %400 = vst.msk [vmem:[%s858_s3 + $0xb8] sm:$0xff] %vm55_vm0, %v334_v62  ;;  %v249_v1 = vadd.f32 %v693_v34, %v248_v63  ;;  %v329_v2 = vadd.f32 %v693_v34, %v328_v0 }
  0xd7   :  { %v498_v3 = vpop.f32.mrf.mxu0  ;;  %v522_v4 = vpop.f32.mrf.mxu1 }
  0xd8   :  { %383 = vst.msk [vmem:[%s858_s3 + $0x30] sm:$0xff] %vm55_vm0, %v249_v1  ;;  %399 = vst.msk [vmem:[%s858_s3 + $0xb0] sm:$0xff] %vm55_vm0, %v329_v2  ;;  %v264_v5 = vadd.f32 %v498_v3, %v693_v34  ;;  %v344_v6 = vadd.f32 %v522_v4, %v693_v34 }
  0xd9   :  { %v258_v7 = vpop.f32.mrf.mxu0  ;;  %v338_v8 = vpop.f32.mrf.mxu1 }
  0xda   :  { %386 = vst.msk [vmem:[%s858_s3 + $0x48] sm:$0xff] %vm55_vm0, %v264_v5  ;;  %402 = vst.msk [vmem:[%s858_s3 + $0xc8] sm:$0xff] %vm55_vm0, %v344_v6  ;;  %v259_v9 = vadd.f32 %v693_v34, %v258_v7  ;;  %v339_v10 = vadd.f32 %v693_v34, %v338_v8 }
  0xdb   :  { %v501_v11 = vpop.f32.mrf.mxu0  ;;  %v525_v12 = vpop.f32.mrf.mxu1 }
  0xdc   :  { %385 = vst.msk [vmem:[%s858_s3 + $0x40] sm:$0xff] %vm55_vm0, %v259_v9  ;;  %401 = vst.msk [vmem:[%s858_s3 + $0xc0] sm:$0xff] %vm55_vm0, %v339_v10  ;;  %v274_v13 = vadd.f32 %v501_v11, %v693_v34  ;;  %v354_v14 = vadd.f32 %v525_v12, %v693_v34 }
  0xdd   :  { %v268_v15 = vpop.f32.mrf.mxu0  ;;  %v348_v16 = vpop.f32.mrf.mxu1 }
  0xde   :  { %388 = vst.msk [vmem:[%s858_s3 + $0x58] sm:$0xff] %vm55_vm0, %v274_v13  ;;  %404 = vst.msk [vmem:[%s858_s3 + $0xd8] sm:$0xff] %vm55_vm0, %v354_v14  ;;  %v269_v17 = vadd.f32 %v693_v34, %v268_v15  ;;  %v349_v18 = vadd.f32 %v693_v34, %v348_v16 }
  0xdf   :  { %v504_v19 = vpop.f32.mrf.mxu0  ;;  %v528_v20 = vpop.f32.mrf.mxu1 }
  0xe0   :  { %387 = vst.msk [vmem:[%s858_s3 + $0x50] sm:$0xff] %vm55_vm0, %v269_v17  ;;  %403 = vst.msk [vmem:[%s858_s3 + $0xd0] sm:$0xff] %vm55_vm0, %v349_v18  ;;  %v284_v21 = vadd.f32 %v504_v19, %v693_v34  ;;  %v364_v22 = vadd.f32 %v528_v20, %v693_v34 }
  0xe1   :  { %v278_v23 = vpop.f32.mrf.mxu0  ;;  %v358_v24 = vpop.f32.mrf.mxu1 }
  0xe2   :  { %390 = vst.msk [vmem:[%s858_s3 + $0x68] sm:$0xff] %vm55_vm0, %v284_v21  ;;  %406 = vst.msk [vmem:[%s858_s3 + $0xe8] sm:$0xff] %vm55_vm0, %v364_v22  ;;  %v279_v25 = vadd.f32 %v693_v34, %v278_v23  ;;  %v359_v26 = vadd.f32 %v693_v34, %v358_v24 }
  0xe3   :  { %v507_v27 = vpop.f32.mrf.mxu0  ;;  %v531_v28 = vpop.f32.mrf.mxu1 }
  0xe4   :  { %389 = vst.msk [vmem:[%s858_s3 + $0x60] sm:$0xff] %vm55_vm0, %v279_v25  ;;  %405 = vst.msk [vmem:[%s858_s3 + $0xe0] sm:$0xff] %vm55_vm0, %v359_v26  ;;  %v294_v29 = vadd.f32 %v507_v27, %v693_v34  ;;  %v374_v30 = vadd.f32 %v531_v28, %v693_v34 }
  0xe5   :  { %v288_v31 = vpop.f32.mrf.mxu0  ;;  %v368_v32 = vpop.f32.mrf.mxu1 }
  0xe6   :  { %392 = vst.msk [vmem:[%s858_s3 + $0x78] sm:$0xff] %vm55_vm0, %v294_v29  ;;  %408 = vst.msk [vmem:[%s858_s3 + $0xf8] sm:$0xff] %vm55_vm0, %v374_v30  ;;  %v289_v33 = vadd.f32 %v693_v34, %v288_v31  ;;  %v369_v35 = vadd.f32 %v693_v34, %v368_v32 }
  0xe8   :  { %391 = vst.msk [vmem:[%s858_s3 + $0x70] sm:$0xff] %vm55_vm0, %v289_v33  ;;  %407 = vst.msk [vmem:[%s858_s3 + $0xf0] sm:$0xff] %vm55_vm0, %v369_v35 }

// kernel: ndlinear_gated_forward.3
= control target key start
LH: loop header
LB: loop body
LE: loop exit
PB: predicated region body
PF: predicated region fallthrough
CT: control target
= control target key end

     0   :  { %vm279_vm0 = vcmask 1043456   ;;  %vm86_vm1 = vcmask 31744   ;;  %vm668_vm2 = vcmask 64512   ;;  %s1572_s1 = inlined_call_operand.vmem [shape: f32[4,8], index: 1, kind: input, shape index: {}]   ;;  %s1573_s0 = inlined_call_operand.vmem [shape: f32[512,4], index: 0, kind: input, shape index: {}]   ;;  %s1574_s2 = inlined_call_operand.vmem [shape: f32[1,8], index: 2, kind: input, shape index: {}]   ;;  %s1575_s3 = inlined_call_operand.vmem [shape: f32[512,8], index: 3, kind: output, shape index: {}]  }
   0x1   :  { %v78_v0 = vld [vmem:[%s1572_s1] sm:$0xf]  ;;  %v15_v3 = vld [vmem:[%s1573_s0 + $0x8] sm:$0xff]  ;;  %v16_v5 = vld [vmem:[%s1573_s0 + $0x10] sm:$0xff] }
   0x2   :  { %v14_v1 = vld [vmem:[%s1573_s0] sm:$0xff]  ;;  %868 = vmatprep.subr.msk.mxu0 %vm279_vm0, %v78_v0  ;;  %966 = vmatprep.subr.msk.mxu1 %vm279_vm0, %v78_v0  ;;  %v47_v4 = vld [vmem:[%s1573_s0 + $0x108] sm:$0xff]  ;;  %v48_v6 = vld [vmem:[%s1573_s0 + $0x110] sm:$0xff] }
   0x3   :  { %v46_v2 = vld [vmem:[%s1573_s0 + $0x100] sm:$0xff]  ;;  %869 = vmatpush3.msk.msra.mxu0 %vm279_vm0, %v78_v0  ;;  %967 = vmatpush3.msk.msra.mxu1 %vm279_vm0, %v78_v0  ;;  %v17_v7 = vld [vmem:[%s1573_s0 + $0x18] sm:$0xff]  ;;  %v19_v11 = vld [vmem:[%s1573_s0 + $0x28] sm:$0xff] }
   0x4   :  { %870 = vmatprep.mubr.msk.f32.mxu0 %vm86_vm1, %v14_v1  ;;  %918 = vmatprep.mubr.msk.f32.mxu1 %vm86_vm1, %v46_v2  ;;  %v49_v8 = vld [vmem:[%s1573_s0 + $0x118] sm:$0xff]  ;;  %v18_v9 = vld [vmem:[%s1573_s0 + $0x20] sm:$0xff]  ;;  %v51_v12 = vld [vmem:[%s1573_s0 + $0x128] sm:$0xff] }
   0x5   :  { %871 = vmatmul.mubr.msk.f32.vlgmr.msra.gmra.mxu0 %vm86_vm1, %v15_v3  ;;  %919 = vmatmul.mubr.msk.f32.vlgmr.msra.gmra.mxu1 %vm86_vm1, %v47_v4  ;;  %v50_v10 = vld [vmem:[%s1573_s0 + $0x120] sm:$0xff]  ;;  %v20_v13 = vld [vmem:[%s1573_s0 + $0x30] sm:$0xff]  ;;  %v21_v15 = vld [vmem:[%s1573_s0 + $0x38] sm:$0xff] }
   0x6   :  { %873 = vmatprep.mubr.msk.f32.mxu0 %vm86_vm1, %v16_v5  ;;  %921 = vmatprep.mubr.msk.f32.mxu1 %vm86_vm1, %v48_v6  ;;  %v52_v14 = vld [vmem:[%s1573_s0 + $0x130] sm:$0xff]  ;;  %v53_v16 = vld [vmem:[%s1573_s0 + $0x138] sm:$0xff]  ;;  %v22_v17 = vld [vmem:[%s1573_s0 + $0x40] sm:$0xff] }
   0x7   :  { %v54_v18 = vld [vmem:[%s1573_s0 + $0x140] sm:$0xff]  ;;  %v23_v19 = vld [vmem:[%s1573_s0 + $0x48] sm:$0xff]  ;;  %v24_v21 = vld [vmem:[%s1573_s0 + $0x50] sm:$0xff] }
   0x8   :  { %v55_v20 = vld [vmem:[%s1573_s0 + $0x148] sm:$0xff]  ;;  %v56_v22 = vld [vmem:[%s1573_s0 + $0x150] sm:$0xff]  ;;  %v25_v23 = vld [vmem:[%s1573_s0 + $0x58] sm:$0xff] }
   0x9   :  { %874 = vmatmul.mubr.msk.f32.gmra.mxu0 %vm86_vm1, %v17_v7  ;;  %922 = vmatmul.mubr.msk.f32.gmra.mxu1 %vm86_vm1, %v49_v8  ;;  %v57_v24 = vld [vmem:[%s1573_s0 + $0x158] sm:$0xff]  ;;  %v26_v25 = vld [vmem:[%s1573_s0 + $0x60] sm:$0xff]  ;;  %v27_v27 = vld [vmem:[%s1573_s0 + $0x68] sm:$0xff] }
   0xa   :  { %876 = vmatprep.mubr.msk.f32.mxu0 %vm86_vm1, %v18_v9  ;;  %924 = vmatprep.mubr.msk.f32.mxu1 %vm86_vm1, %v50_v10  ;;  %v58_v26 = vld [vmem:[%s1573_s0 + $0x160] sm:$0xff]  ;;  %v59_v28 = vld [vmem:[%s1573_s0 + $0x168] sm:$0xff]  ;;  %v28_v29 = vld [vmem:[%s1573_s0 + $0x70] sm:$0xff] }
   0xb   :  { %v60_v30 = vld [vmem:[%s1573_s0 + $0x170] sm:$0xff]  ;;  %v29_v31 = vld [vmem:[%s1573_s0 + $0x78] sm:$0xff]  ;;  %v30_v33 = vld [vmem:[%s1573_s0 + $0x80] sm:$0xff] }
   0xc   :  { %v61_v32 = vld [vmem:[%s1573_s0 + $0x178] sm:$0xff]  ;;  %v62_v34 = vld [vmem:[%s1573_s0 + $0x180] sm:$0xff]  ;;  %v31_v35 = vld [vmem:[%s1573_s0 + $0x88] sm:$0xff] }
   0xd   :  { %877 = vmatmul.mubr.msk.f32.gmra.mxu0 %vm86_vm1, %v19_v11  ;;  %925 = vmatmul.mubr.msk.f32.gmra.mxu1 %vm86_vm1, %v51_v12  ;;  %v63_v36 = vld [vmem:[%s1573_s0 + $0x188] sm:$0xff]  ;;  %v32_v37 = vld [vmem:[%s1573_s0 + $0x90] sm:$0xff]  ;;  %v33_v39 = vld [vmem:[%s1573_s0 + $0x98] sm:$0xff] }
   0xe   :  { %879 = vmatprep.mubr.msk.f32.mxu0 %vm86_vm1, %v20_v13  ;;  %927 = vmatprep.mubr.msk.f32.mxu1 %vm86_vm1, %v52_v14  ;;  %v64_v38 = vld [vmem:[%s1573_s0 + $0x190] sm:$0xff]  ;;  %v65_v40 = vld [vmem:[%s1573_s0 + $0x198] sm:$0xff]  ;;  %v34_v41 = vld [vmem:[%s1573_s0 + $0xa0] sm:$0xff] }
   0xf   :  { %v66_v42 = vld [vmem:[%s1573_s0 + $0x1a0] sm:$0xff]  ;;  %v35_v43 = vld [vmem:[%s1573_s0 + $0xa8] sm:$0xff]  ;;  %v36_v45 = vld [vmem:[%s1573_s0 + $0xb0] sm:$0xff] }
  0x10   :  { %v67_v44 = vld [vmem:[%s1573_s0 + $0x1a8] sm:$0xff]  ;;  %v68_v46 = vld [vmem:[%s1573_s0 + $0x1b0] sm:$0xff]  ;;  %v37_v47 = vld [vmem:[%s1573_s0 + $0xb8] sm:$0xff] }
  0x11   :  { %880 = vmatmul.mubr.msk.f32.gmra.mxu0 %vm86_vm1, %v21_v15  ;;  %928 = vmatmul.mubr.msk.f32.gmra.mxu1 %vm86_vm1, %v53_v16  ;;  %v69_v48 = vld [vmem:[%s1573_s0 + $0x1b8] sm:$0xff]  ;;  %v38_v49 = vld [vmem:[%s1573_s0 + $0xc0] sm:$0xff]  ;;  %v39_v51 = vld [vmem:[%s1573_s0 + $0xc8] sm:$0xff] }
  0x12   :  { %882 = vmatprep.mubr.msk.f32.mxu0 %vm86_vm1, %v22_v17  ;;  %930 = vmatprep.mubr.msk.f32.mxu1 %vm86_vm1, %v54_v18  ;;  %v70_v50 = vld [vmem:[%s1573_s0 + $0x1c0] sm:$0xff]  ;;  %v71_v52 = vld [vmem:[%s1573_s0 + $0x1c8] sm:$0xff]  ;;  %v40_v53 = vld [vmem:[%s1573_s0 + $0xd0] sm:$0xff] }
  0x13   :  { %v72_v54 = vld [vmem:[%s1573_s0 + $0x1d0] sm:$0xff]  ;;  %v41_v55 = vld [vmem:[%s1573_s0 + $0xd8] sm:$0xff]  ;;  %v42_v57 = vld [vmem:[%s1573_s0 + $0xe0] sm:$0xff] }
  0x14   :  { %v73_v56 = vld [vmem:[%s1573_s0 + $0x1d8] sm:$0xff]  ;;  %v74_v58 = vld [vmem:[%s1573_s0 + $0x1e0] sm:$0xff]  ;;  %v43_v59 = vld [vmem:[%s1573_s0 + $0xe8] sm:$0xff] }
  0x15   :  { %883 = vmatmul.mubr.msk.f32.gmra.mxu0 %vm86_vm1, %v23_v19  ;;  %931 = vmatmul.mubr.msk.f32.gmra.mxu1 %vm86_vm1, %v55_v20  ;;  %v75_v60 = vld [vmem:[%s1573_s0 + $0x1e8] sm:$0xff]  ;;  %v44_v61 = vld [vmem:[%s1573_s0 + $0xf0] sm:$0xff]  ;;  %v45_v63 = vld [vmem:[%s1573_s0 + $0xf8] sm:$0xff] }
  0x16   :  { %885 = vmatprep.mubr.msk.f32.mxu0 %vm86_vm1, %v24_v21  ;;  %933 = vmatprep.mubr.msk.f32.mxu1 %vm86_vm1, %v56_v22  ;;  %v76_v62 = vld [vmem:[%s1573_s0 + $0x1f0] sm:$0xff]  ;;  %v77_v0 = vld [vmem:[%s1573_s0 + $0x1f8] sm:$0xff]  ;;  %v1250_v1 = vld [vmem:[%s1574_s2] ss:$0 sm:$0xff] }
  0x19   :  { %886 = vmatmul.mubr.msk.f32.gmra.mxu0 %vm86_vm1, %v25_v23  ;;  %934 = vmatmul.mubr.msk.f32.gmra.mxu1 %vm86_vm1, %v57_v24 }
  0x1a   :  { %888 = vmatprep.mubr.msk.f32.mxu0 %vm86_vm1, %v26_v25  ;;  %936 = vmatprep.mubr.msk.f32.mxu1 %vm86_vm1, %v58_v26 }
  0x1d   :  { %889 = vmatmul.mubr.msk.f32.gmra.mxu0 %vm86_vm1, %v27_v27  ;;  %937 = vmatmul.mubr.msk.f32.gmra.mxu1 %vm86_vm1, %v59_v28 }
  0x1e   :  { %891 = vmatprep.mubr.msk.f32.mxu0 %vm86_vm1, %v28_v29  ;;  %939 = vmatprep.mubr.msk.f32.mxu1 %vm86_vm1, %v60_v30 }
  0x21   :  { %892 = vmatmul.mubr.msk.f32.gmra.mxu0 %vm86_vm1, %v29_v31  ;;  %940 = vmatmul.mubr.msk.f32.gmra.mxu1 %vm86_vm1, %v61_v32 }
  0x22   :  { %894 = vmatprep.mubr.msk.f32.mxu0 %vm86_vm1, %v30_v33  ;;  %942 = vmatprep.mubr.msk.f32.mxu1 %vm86_vm1, %v62_v34 }
  0x25   :  { %895 = vmatmul.mubr.msk.f32.gmra.mxu0 %vm86_vm1, %v31_v35  ;;  %943 = vmatmul.mubr.msk.f32.gmra.mxu1 %vm86_vm1, %v63_v36 }
  0x26   :  { %897 = vmatprep.mubr.msk.f32.mxu0 %vm86_vm1, %v32_v37  ;;  %945 = vmatprep.mubr.msk.f32.mxu1 %vm86_vm1, %v64_v38 }
  0x29   :  { %898 = vmatmul.mubr.msk.f32.gmra.mxu0 %vm86_vm1, %v33_v39  ;;  %946 = vmatmul.mubr.msk.f32.gmra.mxu1 %vm86_vm1, %v65_v40 }
  0x2a   :  { %900 = vmatprep.mubr.msk.f32.mxu0 %vm86_vm1, %v34_v41  ;;  %948 = vmatprep.mubr.msk.f32.mxu1 %vm86_vm1, %v66_v42 }
  0x2d   :  { %901 = vmatmul.mubr.msk.f32.gmra.mxu0 %vm86_vm1, %v35_v43  ;;  %949 = vmatmul.mubr.msk.f32.gmra.mxu1 %vm86_vm1, %v67_v44 }
  0x2e   :  { %903 = vmatprep.mubr.msk.f32.mxu0 %vm86_vm1, %v36_v45  ;;  %951 = vmatprep.mubr.msk.f32.mxu1 %vm86_vm1, %v68_v46 }
  0x31   :  { %904 = vmatmul.mubr.msk.f32.gmra.mxu0 %vm86_vm1, %v37_v47  ;;  %952 = vmatmul.mubr.msk.f32.gmra.mxu1 %vm86_vm1, %v69_v48 }
  0x32   :  { %906 = vmatprep.mubr.msk.f32.mxu0 %vm86_vm1, %v38_v49  ;;  %954 = vmatprep.mubr.msk.f32.mxu1 %vm86_vm1, %v70_v50 }
  0x35   :  { %907 = vmatmul.mubr.msk.f32.gmra.mxu0 %vm86_vm1, %v39_v51  ;;  %955 = vmatmul.mubr.msk.f32.gmra.mxu1 %vm86_vm1, %v71_v52 }
  0x36   :  { %909 = vmatprep.mubr.msk.f32.mxu0 %vm86_vm1, %v40_v53  ;;  %957 = vmatprep.mubr.msk.f32.mxu1 %vm86_vm1, %v72_v54 }
  0x39   :  { %910 = vmatmul.mubr.msk.f32.gmra.mxu0 %vm86_vm1, %v41_v55  ;;  %958 = vmatmul.mubr.msk.f32.gmra.mxu1 %vm86_vm1, %v73_v56 }
  0x3a   :  { %912 = vmatprep.mubr.msk.f32.mxu0 %vm86_vm1, %v42_v57  ;;  %960 = vmatprep.mubr.msk.f32.mxu1 %vm86_vm1, %v74_v58 }
  0x3d   :  { %913 = vmatmul.mubr.msk.f32.gmra.mxu0 %vm86_vm1, %v43_v59  ;;  %961 = vmatmul.mubr.msk.f32.gmra.mxu1 %vm86_vm1, %v75_v60 }
  0x3e   :  { %915 = vmatprep.mubr.msk.f32.mxu0 %vm86_vm1, %v44_v61  ;;  %963 = vmatprep.mubr.msk.f32.mxu1 %vm86_vm1, %v76_v62 }
  0x41   :  { %916 = vmatmul.mubr.msk.f32.gmra.mxu0 %vm86_vm1, %v45_v63  ;;  %964 = vmatmul.mubr.msk.f32.gmra.mxu1 %vm86_vm1, %v77_v0 }
  0xc5   :  { %v872_v2 = vpop.f32.mrf.mxu0  ;;  %v920_v3 = vpop.f32.mrf.mxu1 }
  0xc6   :  { %v355_v4 = vadd.f32 %v872_v2, %v1250_v1  ;;  %v515_v5 = vadd.f32 %v920_v3, %v1250_v1 }
  0xc7   :  { %v349_v6 = vpop.f32.mrf.mxu0  ;;  %v509_v7 = vpop.f32.mrf.mxu1 }
  0xc8   :  { %670 = vst.msk [vmem:[%s1575_s3 + $0x8] sm:$0xff] %vm668_vm2, %v355_v4  ;;  %702 = vst.msk [vmem:[%s1575_s3 + $0x108] sm:$0xff] %vm668_vm2, %v515_v5  ;;  %v350_v8 = vadd.f32 %v1250_v1, %v349_v6  ;;  %v510_v9 = vadd.f32 %v1250_v1, %v509_v7 }
  0xc9   :  { %v875_v10 = vpop.f32.mrf.mxu0  ;;  %v923_v11 = vpop.f32.mrf.mxu1 }
  0xca   :  { %669 = vst.msk [vmem:[%s1575_s3] sm:$0xff] %vm668_vm2, %v350_v8  ;;  %701 = vst.msk [vmem:[%s1575_s3 + $0x100] sm:$0xff] %vm668_vm2, %v510_v9  ;;  %v365_v12 = vadd.f32 %v875_v10, %v1250_v1  ;;  %v525_v13 = vadd.f32 %v923_v11, %v1250_v1 }
  0xcb   :  { %v359_v14 = vpop.f32.mrf.mxu0  ;;  %v519_v15 = vpop.f32.mrf.mxu1 }
  0xcc   :  { %672 = vst.msk [vmem:[%s1575_s3 + $0x18] sm:$0xff] %vm668_vm2, %v365_v12  ;;  %704 = vst.msk [vmem:[%s1575_s3 + $0x118] sm:$0xff] %vm668_vm2, %v525_v13  ;;  %v360_v16 = vadd.f32 %v1250_v1, %v359_v14  ;;  %v520_v17 = vadd.f32 %v1250_v1, %v519_v15 }
  0xcd   :  { %v878_v18 = vpop.f32.mrf.mxu0  ;;  %v926_v19 = vpop.f32.mrf.mxu1 }
  0xce   :  { %671 = vst.msk [vmem:[%s1575_s3 + $0x10] sm:$0xff] %vm668_vm2, %v360_v16  ;;  %703 = vst.msk [vmem:[%s1575_s3 + $0x110] sm:$0xff] %vm668_vm2, %v520_v17  ;;  %v375_v20 = vadd.f32 %v878_v18, %v1250_v1  ;;  %v535_v21 = vadd.f32 %v926_v19, %v1250_v1 }
  0xcf   :  { %v369_v22 = vpop.f32.mrf.mxu0  ;;  %v529_v23 = vpop.f32.mrf.mxu1 }
  0xd0   :  { %674 = vst.msk [vmem:[%s1575_s3 + $0x28] sm:$0xff] %vm668_vm2, %v375_v20  ;;  %706 = vst.msk [vmem:[%s1575_s3 + $0x128] sm:$0xff] %vm668_vm2, %v535_v21  ;;  %v370_v24 = vadd.f32 %v1250_v1, %v369_v22  ;;  %v530_v25 = vadd.f32 %v1250_v1, %v529_v23 }
  0xd1   :  { %v881_v26 = vpop.f32.mrf.mxu0  ;;  %v929_v27 = vpop.f32.mrf.mxu1 }
  0xd2   :  { %673 = vst.msk [vmem:[%s1575_s3 + $0x20] sm:$0xff] %vm668_vm2, %v370_v24  ;;  %705 = vst.msk [vmem:[%s1575_s3 + $0x120] sm:$0xff] %vm668_vm2, %v530_v25  ;;  %v385_v28 = vadd.f32 %v881_v26, %v1250_v1  ;;  %v545_v29 = vadd.f32 %v929_v27, %v1250_v1 }
  0xd3   :  { %v379_v30 = vpop.f32.mrf.mxu0  ;;  %v539_v31 = vpop.f32.mrf.mxu1 }
  0xd4   :  { %676 = vst.msk [vmem:[%s1575_s3 + $0x38] sm:$0xff] %vm668_vm2, %v385_v28  ;;  %708 = vst.msk [vmem:[%s1575_s3 + $0x138] sm:$0xff] %vm668_vm2, %v545_v29  ;;  %v380_v32 = vadd.f32 %v1250_v1, %v379_v30  ;;  %v540_v33 = vadd.f32 %v1250_v1, %v539_v31 }
  0xd5   :  { %v884_v34 = vpop.f32.mrf.mxu0  ;;  %v932_v35 = vpop.f32.mrf.mxu1 }
  0xd6   :  { %675 = vst.msk [vmem:[%s1575_s3 + $0x30] sm:$0xff] %vm668_vm2, %v380_v32  ;;  %707 = vst.msk [vmem:[%s1575_s3 + $0x130] sm:$0xff] %vm668_vm2, %v540_v33  ;;  %v395_v36 = vadd.f32 %v884_v34, %v1250_v1  ;;  %v555_v37 = vadd.f32 %v932_v35, %v1250_v1 }
  0xd7   :  { %v389_v38 = vpop.f32.mrf.mxu0  ;;  %v549_v39 = vpop.f32.mrf.mxu1 }
  0xd8   :  { %678 = vst.msk [vmem:[%s1575_s3 + $0x48] sm:$0xff] %vm668_vm2, %v395_v36  ;;  %710 = vst.msk [vmem:[%s1575_s3 + $0x148] sm:$0xff] %vm668_vm2, %v555_v37  ;;  %v390_v40 = vadd.f32 %v1250_v1, %v389_v38  ;;  %v550_v41 = vadd.f32 %v1250_v1, %v549_v39 }
  0xd9   :  { %v887_v42 = vpop.f32.mrf.mxu0  ;;  %v935_v43 = vpop.f32.mrf.mxu1 }
  0xda   :  { %677 = vst.msk [vmem:[%s1575_s3 + $0x40] sm:$0xff] %vm668_vm2, %v390_v40  ;;  %709 = vst.msk [vmem:[%s1575_s3 + $0x140] sm:$0xff] %vm668_vm2, %v550_v41  ;;  %v405_v44 = vadd.f32 %v887_v42, %v1250_v1  ;;  %v565_v45 = vadd.f32 %v935_v43, %v1250_v1 }
  0xdb   :  { %v399_v46 = vpop.f32.mrf.mxu0  ;;  %v559_v47 = vpop.f32.mrf.mxu1 }
  0xdc   :  { %680 = vst.msk [vmem:[%s1575_s3 + $0x58] sm:$0xff] %vm668_vm2, %v405_v44  ;;  %712 = vst.msk [vmem:[%s1575_s3 + $0x158] sm:$0xff] %vm668_vm2, %v565_v45  ;;  %v400_v48 = vadd.f32 %v1250_v1, %v399_v46  ;;  %v560_v49 = vadd.f32 %v1250_v1, %v559_v47 }
  0xdd   :  { %v890_v50 = vpop.f32.mrf.mxu0  ;;  %v938_v51 = vpop.f32.mrf.mxu1 }
  0xde   :  { %679 = vst.msk [vmem:[%s1575_s3 + $0x50] sm:$0xff] %vm668_vm2, %v400_v48  ;;  %711 = vst.msk [vmem:[%s1575_s3 + $0x150] sm:$0xff] %vm668_vm2, %v560_v49  ;;  %v415_v52 = vadd.f32 %v890_v50, %v1250_v1  ;;  %v575_v53 = vadd.f32 %v938_v51, %v1250_v1 }
  0xdf   :  { %v409_v54 = vpop.f32.mrf.mxu0  ;;  %v569_v55 = vpop.f32.mrf.mxu1 }
  0xe0   :  { %682 = vst.msk [vmem:[%s1575_s3 + $0x68] sm:$0xff] %vm668_vm2, %v415_v52  ;;  %714 = vst.msk [vmem:[%s1575_s3 + $0x168] sm:$0xff] %vm668_vm2, %v575_v53  ;;  %v410_v56 = vadd.f32 %v1250_v1, %v409_v54  ;;  %v570_v57 = vadd.f32 %v1250_v1, %v569_v55 }
  0xe1   :  { %v893_v58 = vpop.f32.mrf.mxu0  ;;  %v941_v59 = vpop.f32.mrf.mxu1 }
  0xe2   :  { %681 = vst.msk [vmem:[%s1575_s3 + $0x60] sm:$0xff] %vm668_vm2, %v410_v56  ;;  %713 = vst.msk [vmem:[%s1575_s3 + $0x160] sm:$0xff] %vm668_vm2, %v570_v57  ;;  %v425_v60 = vadd.f32 %v893_v58, %v1250_v1  ;;  %v585_v61 = vadd.f32 %v941_v59, %v1250_v1 }
  0xe3   :  { %v419_v62 = vpop.f32.mrf.mxu0  ;;  %v579_v63 = vpop.f32.mrf.mxu1 }
  0xe4   :  { %684 = vst.msk [vmem:[%s1575_s3 + $0x78] sm:$0xff] %vm668_vm2, %v425_v60  ;;  %716 = vst.msk [vmem:[%s1575_s3 + $0x178] sm:$0xff] %vm668_vm2, %v585_v61  ;;  %v420_v0 = vadd.f32 %v1250_v1, %v419_v62  ;;  %v580_v2 = vadd.f32 %v1250_v1, %v579_v63 }
  0xe5   :  { %v896_v3 = vpop.f32.mrf.mxu0  ;;  %v944_v4 = vpop.f32.mrf.mxu1 }
  0xe6   :  { %683 = vst.msk [vmem:[%s1575_s3 + $0x70] sm:$0xff] %vm668_vm2, %v420_v0  ;;  %715 = vst.msk [vmem:[%s1575_s3 + $0x170] sm:$0xff] %vm668_vm2, %v580_v2  ;;  %v435_v5 = vadd.f32 %v896_v3, %v1250_v1  ;;  %v595_v6 = vadd.f32 %v944_v4, %v1250_v1 }
  0xe7   :  { %v429_v7 = vpop.f32.mrf.mxu0  ;;  %v589_v8 = vpop.f32.mrf.mxu1 }
  0xe8   :  { %686 = vst.msk [vmem:[%s1575_s3 + $0x88] sm:$0xff] %vm668_vm2, %v435_v5  ;;  %718 = vst.msk [vmem:[%s1575_s3 + $0x188] sm:$0xff] %vm668_vm2, %v595_v6  ;;  %v430_v9 = vadd.f32 %v1250_v1, %v429_v7  ;;  %v590_v10 = vadd.f32 %v1250_v1, %v589_v8 }
  0xe9   :  { %v899_v11 = vpop.f32.mrf.mxu0  ;;  %v947_v12 = vpop.f32.mrf.mxu1 }
  0xea   :  { %685 = vst.msk [vmem:[%s1575_s3 + $0x80] sm:$0xff] %vm668_vm2, %v430_v9  ;;  %717 = vst.msk [vmem:[%s1575_s3 + $0x180] sm:$0xff] %vm668_vm2, %v590_v10  ;;  %v445_v13 = vadd.f32 %v899_v11, %v1250_v1  ;;  %v605_v14 = vadd.f32 %v947_v12, %v1250_v1 }
  0xeb   :  { %v439_v15 = vpop.f32.mrf.mxu0  ;;  %v599_v16 = vpop.f32.mrf.mxu1 }
  0xec   :  { %688 = vst.msk [vmem:[%s1575_s3 + $0x98] sm:$0xff] %vm668_vm2, %v445_v13  ;;  %720 = vst.msk [vmem:[%s1575_s3 + $0x198] sm:$0xff] %vm668_vm2, %v605_v14  ;;  %v440_v17 = vadd.f32 %v1250_v1, %v439_v15  ;;  %v600_v18 = vadd.f32 %v1250_v1, %v599_v16 }
  0xed   :  { %v902_v19 = vpop.f32.mrf.mxu0  ;;  %v950_v20 = vpop.f32.mrf.mxu1 }
  0xee   :  { %687 = vst.msk [vmem:[%s1575_s3 + $0x90] sm:$0xff] %vm668_vm2, %v440_v17  ;;  %719 = vst.msk [vmem:[%s1575_s3 + $0x190] sm:$0xff] %vm668_vm2, %v600_v18  ;;  %v455_v21 = vadd.f32 %v902_v19, %v1250_v1  ;;  %v615_v22 = vadd.f32 %v950_v20, %v1250_v1 }
  0xef   :  { %v449_v23 = vpop.f32.mrf.mxu0  ;;  %v609_v24 = vpop.f32.mrf.mxu1 }
  0xf0   :  { %690 = vst.msk [vmem:[%s1575_s3 + $0xa8] sm:$0xff] %vm668_vm2, %v455_v21  ;;  %722 = vst.msk [vmem:[%s1575_s3 + $0x1a8] sm:$0xff] %vm668_vm2, %v615_v22  ;;  %v450_v25 = vadd.f32 %v1250_v1, %v449_v23  ;;  %v610_v26 = vadd.f32 %v1250_v1, %v609_v24 }
  0xf1   :  { %v905_v27 = vpop.f32.mrf.mxu0  ;;  %v953_v28 = vpop.f32.mrf.mxu1 }
  0xf2   :  { %689 = vst.msk [vmem:[%s1575_s3 + $0xa0] sm:$0xff] %vm668_vm2, %v450_v25  ;;  %721 = vst.msk [vmem:[%s1575_s3 + $0x1a0] sm:$0xff] %vm668_vm2, %v610_v26  ;;  %v465_v29 = vadd.f32 %v905_v27, %v1250_v1  ;;  %v625_v30 = vadd.f32 %v953_v28, %v1250_v1 }
  0xf3   :  { %v459_v31 = vpop.f32.mrf.mxu0  ;;  %v619_v32 = vpop.f32.mrf.mxu1 }
  0xf4   :  { %692 = vst.msk [vmem:[%s1575_s3 + $0xb8] sm:$0xff] %vm668_vm2, %v465_v29  ;;  %724 = vst.msk [vmem:[%s1575_s3 + $0x1b8] sm:$0xff] %vm668_vm2, %v625_v30  ;;  %v460_v33 = vadd.f32 %v1250_v1, %v459_v31  ;;  %v620_v34 = vadd.f32 %v1250_v1, %v619_v32 }
  0xf5   :  { %v908_v35 = vpop.f32.mrf.mxu0  ;;  %v956_v36 = vpop.f32.mrf.mxu1 }
  0xf6   :  { %691 = vst.msk [vmem:[%s1575_s3 + $0xb0] sm:$0xff] %vm668_vm2, %v460_v33  ;;  %723 = vst.msk [vmem:[%s1575_s3 + $0x1b0] sm:$0xff] %vm668_vm2, %v620_v34  ;;  %v475_v37 = vadd.f32 %v908_v35, %v1250_v1  ;;  %v635_v38 = vadd.f32 %v956_v36, %v1250_v1 }
  0xf7   :  { %v469_v39 = vpop.f32.mrf.mxu0  ;;  %v629_v40 = vpop.f32.mrf.mxu1 }
  0xf8   :  { %694 = vst.msk [vmem:[%s1575_s3 + $0xc8] sm:$0xff] %vm668_vm2, %v475_v37  ;;  %726 = vst.msk [vmem:[%s1575_s3 + $0x1c8] sm:$0xff] %vm668_vm2, %v635_v38  ;;  %v470_v41 = vadd.f32 %v1250_v1, %v469_v39  ;;  %v630_v42 = vadd.f32 %v1250_v1, %v629_v40 }
  0xf9   :  { %v911_v43 = vpop.f32.mrf.mxu0  ;;  %v959_v44 = vpop.f32.mrf.mxu1 }
  0xfa   :  { %693 = vst.msk [vmem:[%s1575_s3 + $0xc0] sm:$0xff] %vm668_vm2, %v470_v41  ;;  %725 = vst.msk [vmem:[%s1575_s3 + $0x1c0] sm:$0xff] %vm668_vm2, %v630_v42  ;;  %v485_v45 = vadd.f32 %v911_v43, %v1250_v1  ;;  %v645_v46 = vadd.f32 %v959_v44, %v1250_v1 }
  0xfb   :  { %v479_v47 = vpop.f32.mrf.mxu0  ;;  %v639_v48 = vpop.f32.mrf.mxu1 }
  0xfc   :  { %696 = vst.msk [vmem:[%s1575_s3 + $0xd8] sm:$0xff] %vm668_vm2, %v485_v45  ;;  %728 = vst.msk [vmem:[%s1575_s3 + $0x1d8] sm:$0xff] %vm668_vm2, %v645_v46  ;;  %v480_v49 = vadd.f32 %v1250_v1, %v479_v47  ;;  %v640_v50 = vadd.f32 %v1250_v1, %v639_v48 }
  0xfd   :  { %v914_v51 = vpop.f32.mrf.mxu0  ;;  %v962_v52 = vpop.f32.mrf.mxu1 }
  0xfe   :  { %695 = vst.msk [vmem:[%s1575_s3 + $0xd0] sm:$0xff] %vm668_vm2, %v480_v49  ;;  %727 = vst.msk [vmem:[%s1575_s3 + $0x1d0] sm:$0xff] %vm668_vm2, %v640_v50  ;;  %v495_v53 = vadd.f32 %v914_v51, %v1250_v1  ;;  %v655_v54 = vadd.f32 %v962_v52, %v1250_v1 }
  0xff   :  { %v489_v55 = vpop.f32.mrf.mxu0  ;;  %v649_v56 = vpop.f32.mrf.mxu1 }
 0x100   :  { %698 = vst.msk [vmem:[%s1575_s3 + $0xe8] sm:$0xff] %vm668_vm2, %v495_v53  ;;  %730 = vst.msk [vmem:[%s1575_s3 + $0x1e8] sm:$0xff] %vm668_vm2, %v655_v54  ;;  %v490_v57 = vadd.f32 %v1250_v1, %v489_v55  ;;  %v650_v58 = vadd.f32 %v1250_v1, %v649_v56 }
 0x101   :  { %v917_v59 = vpop.f32.mrf.mxu0  ;;  %v965_v60 = vpop.f32.mrf.mxu1 }
 0x102   :  { %697 = vst.msk [vmem:[%s1575_s3 + $0xe0] sm:$0xff] %vm668_vm2, %v490_v57  ;;  %729 = vst.msk [vmem:[%s1575_s3 + $0x1e0] sm:$0xff] %vm668_vm2, %v650_v58  ;;  %v505_v61 = vadd.f32 %v917_v59, %v1250_v1  ;;  %v665_v62 = vadd.f32 %v965_v60, %v1250_v1 }
 0x103   :  { %v499_v63 = vpop.f32.mrf.mxu0  ;;  %v659_v0 = vpop.f32.mrf.mxu1 }
 0x104   :  { %700 = vst.msk [vmem:[%s1575_s3 + $0xf8] sm:$0xff] %vm668_vm2, %v505_v61  ;;  %732 = vst.msk [vmem:[%s1575_s3 + $0x1f8] sm:$0xff] %vm668_vm2, %v665_v62  ;;  %v500_v2 = vadd.f32 %v1250_v1, %v499_v63  ;;  %v660_v3 = vadd.f32 %v1250_v1, %v659_v0 }
 0x106   :  { %699 = vst.msk [vmem:[%s1575_s3 + $0xf0] sm:$0xff] %vm668_vm2, %v500_v2  ;;  %731 = vst.msk [vmem:[%s1575_s3 + $0x1f0] sm:$0xff] %vm668_vm2, %v660_v3 }

// kernel: ndlinear_gated_forward.5
= control target key start
LH: loop header
LB: loop body
LE: loop exit
PB: predicated region body
PF: predicated region fallthrough
CT: control target
= control target key end

     0   :  { %vm56_vm0 = vcmask 130048   ;;  %s804_s0 = inlined_call_operand.vmem [shape: f32[256,16], index: 0, kind: input, shape index: {}]   ;;  %s805_s1 = inlined_call_operand.vmem [shape: f32[16,32], index: 1, kind: input, shape index: {}]   ;;  %s806_s2 = inlined_call_operand.vmem [shape: f32[1,32], index: 2, kind: input, shape index: {}]   ;;  %s807_s3 = inlined_call_operand.hbm [shape: f32[256,32], index: 3, kind: output, shape index: {}]  }
   0x1   :  { %v48_v0 = vld [vmem:[%s805_s1 + $0x8] sm:$0xff]  ;;  %v47_v1 = vld [vmem:[%s805_s1] sm:$0xff]  ;;  %v17_v6 = vld [vmem:[%s804_s0 + $0x10] sm:$0xff] }
   0x2   :  { %494 = vmatprep.subr.mxu0 %v48_v0  ;;  %546 = vmatprep.subr.mxu1 %v48_v0  ;;  %v15_v2 = vld [vmem:[%s804_s0] sm:$0xff]  ;;  %v16_v4 = vld [vmem:[%s804_s0 + $0x8] sm:$0xff]  ;;  %v33_v7 = vld [vmem:[%s804_s0 + $0x90] sm:$0xff] }
   0x3   :  { %495 = vmatpush3.msra.mxu0 %v48_v0  ;;  %548 = vmatpush3.msra.mxu1 %v48_v0  ;;  %v31_v3 = vld [vmem:[%s804_s0 + $0x80] sm:$0xff]  ;;  %v32_v5 = vld [vmem:[%s804_s0 + $0x88] sm:$0xff]  ;;  %v18_v8 = vld [vmem:[%s804_s0 + $0x18] sm:$0xff] }
   0x4   :  { %496 = vmatprep.subr.mxu0 %v47_v1  ;;  %547 = vmatprep.subr.mxu1 %v47_v1  ;;  %v34_v9 = vld [vmem:[%s804_s0 + $0x98] sm:$0xff]  ;;  %v19_v10 = vld [vmem:[%s804_s0 + $0x20] sm:$0xff]  ;;  %v20_v12 = vld [vmem:[%s804_s0 + $0x28] sm:$0xff] }
   0x5   :  { %497 = vmatpush3.msra.mxu0 %v47_v1  ;;  %549 = vmatpush3.msra.mxu1 %v47_v1  ;;  %v35_v11 = vld [vmem:[%s804_s0 + $0xa0] sm:$0xff]  ;;  %v36_v13 = vld [vmem:[%s804_s0 + $0xa8] sm:$0xff] }
   0x6   :  { %498 = vmatprep.mubr.msk.f32.mxu0 %vm56_vm0, %v15_v2  ;;  %522 = vmatprep.mubr.msk.f32.mxu1 %vm56_vm0, %v31_v3 }
   0x7   :  { %499 = vmatmul.mubr.msk.f32.vlgmr.msra.gmra.mxu0 %vm56_vm0, %v16_v4  ;;  %523 = vmatmul.mubr.msk.f32.vlgmr.msra.gmra.mxu1 %vm56_vm0, %v32_v5 }
   0x8   :  { %501 = vmatprep.mubr.msk.f32.mxu0 %vm56_vm0, %v17_v6  ;;  %525 = vmatprep.mubr.msk.f32.mxu1 %vm56_vm0, %v33_v7 }
   0xb   :  { %502 = vmatmul.mubr.msk.f32.gmra.mxu0 %vm56_vm0, %v18_v8  ;;  %526 = vmatmul.mubr.msk.f32.gmra.mxu1 %vm56_vm0, %v34_v9 }
   0xc   :  { %504 = vmatprep.mubr.msk.f32.mxu0 %vm56_vm0, %v19_v10  ;;  %528 = vmatprep.mubr.msk.f32.mxu1 %vm56_vm0, %v35_v11 }
   0xd   :  { %8 = vsyncpa [#allocation3], 0  ;;  %v21_v14 = vld [vmem:[%s804_s0 + $0x30] sm:$0xff]  ;;  %v22_v16 = vld [vmem:[%s804_s0 + $0x38] sm:$0xff]  ;;  %vm378_vm1 = vcmask 261120  }
   0xe   :  { %v37_v15 = vld [vmem:[%s804_s0 + $0xb0] sm:$0xff]  ;;  %v38_v17 = vld [vmem:[%s804_s0 + $0xb8] sm:$0xff]  ;;  %v23_v18 = vld [vmem:[%s804_s0 + $0x40] sm:$0xff] }
   0xf   :  { %505 = vmatmul.mubr.msk.f32.gmra.mxu0 %vm56_vm0, %v20_v12  ;;  %529 = vmatmul.mubr.msk.f32.gmra.mxu1 %vm56_vm0, %v36_v13  ;;  %v39_v19 = vld [vmem:[%s804_s0 + $0xc0] sm:$0xff]  ;;  %v24_v20 = vld [vmem:[%s804_s0 + $0x48] sm:$0xff]  ;;  %v25_v22 = vld [vmem:[%s804_s0 + $0x50] sm:$0xff] }
  0x10   :  { %507 = vmatprep.mubr.msk.f32.mxu0 %vm56_vm0, %v21_v14  ;;  %531 = vmatprep.mubr.msk.f32.mxu1 %vm56_vm0, %v37_v15  ;;  %v40_v21 = vld [vmem:[%s804_s0 + $0xc8] sm:$0xff]  ;;  %v41_v23 = vld [vmem:[%s804_s0 + $0xd0] sm:$0xff]  ;;  %v26_v24 = vld [vmem:[%s804_s0 + $0x58] sm:$0xff] }
  0x11   :  { %v42_v25 = vld [vmem:[%s804_s0 + $0xd8] sm:$0xff]  ;;  %v27_v26 = vld [vmem:[%s804_s0 + $0x60] sm:$0xff]  ;;  %v28_v28 = vld [vmem:[%s804_s0 + $0x68] sm:$0xff] }
  0x12   :  { %v43_v27 = vld [vmem:[%s804_s0 + $0xe0] sm:$0xff]  ;;  %v44_v29 = vld [vmem:[%s804_s0 + $0xe8] sm:$0xff]  ;;  %v29_v30 = vld [vmem:[%s804_s0 + $0x70] sm:$0xff] }
  0x13   :  { %508 = vmatmul.mubr.msk.f32.gmra.mxu0 %vm56_vm0, %v22_v16  ;;  %532 = vmatmul.mubr.msk.f32.gmra.mxu1 %vm56_vm0, %v38_v17  ;;  %v45_v31 = vld [vmem:[%s804_s0 + $0xf0] sm:$0xff]  ;;  %v30_v32 = vld [vmem:[%s804_s0 + $0x78] sm:$0xff]  ;;  %v735_v34 = vld [vmem:[%s806_s2] ss:$0 sm:$0xff] }
  0x14   :  { %510 = vmatprep.mubr.msk.f32.mxu0 %vm56_vm0, %v23_v18  ;;  %534 = vmatprep.mubr.msk.f32.mxu1 %vm56_vm0, %v39_v19  ;;  %v46_v33 = vld [vmem:[%s804_s0 + $0xf8] sm:$0xff]  ;;  %s575_s0 = smov [#allocation2]  }
  0x15   :  { %s416_s2 = sshll.u32 %s575_s0, 4  ;;  %s417_s2 = int_to_ptr.vmem [resolvable:$true] %s416_s2 }
  0x16   :  { %s553_s25 = scalar_lea.vmem %s417_s2, 4096  ;;  %p558_p1 = scmp.lt.s32.totalorder %s417_s2, %s417_s2 }
  0x17   :  { %511 = vmatmul.mubr.msk.f32.gmra.mxu0 %vm56_vm0, %v24_v20  ;;  %535 = vmatmul.mubr.msk.f32.gmra.mxu1 %vm56_vm0, %v40_v21  ;;  %p554_p0 = scmp.ne.s32.totalorder %s417_s2, %s553_s25  ;;  %p559_p2 = scmp.lt.s32.totalorder %s553_s25, %s553_s25 }
  0x18   :  { %513 = vmatprep.mubr.msk.f32.mxu0 %vm56_vm0, %v25_v22  ;;  %537 = vmatprep.mubr.msk.f32.mxu1 %vm56_vm0, %v41_v23 }
  0x19   :  { %p560_p3 = por %p559_p2, %p558_p1 }
  0x1b   :  { %514 = vmatmul.mubr.msk.f32.gmra.mxu0 %vm56_vm0, %v26_v24  ;;  %538 = vmatmul.mubr.msk.f32.gmra.mxu1 %vm56_vm0, %v42_v25  ;;  %p561_p4 = pnand %p560_p3, %p554_p0 }
  0x1c   :  { %516 = vmatprep.mubr.msk.f32.mxu0 %vm56_vm0, %v27_v26  ;;  %540 = vmatprep.mubr.msk.f32.mxu1 %vm56_vm0, %v43_v27 }
  0x1f   :  { %517 = vmatmul.mubr.msk.f32.gmra.mxu0 %vm56_vm0, %v28_v28  ;;  %541 = vmatmul.mubr.msk.f32.gmra.mxu1 %vm56_vm0, %v44_v29 }
  0x20   :  { %519 = vmatprep.mubr.msk.f32.mxu0 %vm56_vm0, %v29_v30  ;;  %543 = vmatprep.mubr.msk.f32.mxu1 %vm56_vm0, %v45_v31 }
  0x23   :  { %520 = vmatmul.mubr.msk.f32.gmra.mxu0 %vm56_vm0, %v30_v32  ;;  %544 = vmatmul.mubr.msk.f32.gmra.mxu1 %vm56_vm0, %v46_v33 }
  0xc7   :  { %v500_v35 = vpop.f32.mrf.mxu0  ;;  %v524_v36 = vpop.f32.mrf.mxu1 }
  0xc8   :  { %v225_v37 = vadd.f32 %v500_v35, %v735_v34  ;;  %v305_v38 = vadd.f32 %v524_v36, %v735_v34 }
  0xc9   :  { %v219_v39 = vpop.f32.mrf.mxu0  ;;  %v299_v40 = vpop.f32.mrf.mxu1 }
  0xca   :  { %380 = vst.msk [vmem:[#allocation2 + $0x8] sm:$0xff] %vm378_vm1, %v225_v37  ;;  %396 = vst.msk [vmem:[#allocation2 + $0x88] sm:$0xff] %vm378_vm1, %v305_v38  ;;  %v220_v41 = vadd.f32 %v735_v34, %v219_v39  ;;  %v300_v42 = vadd.f32 %v735_v34, %v299_v40 }
  0xcb   :  { %v503_v43 = vpop.f32.mrf.mxu0  ;;  %v527_v44 = vpop.f32.mrf.mxu1 }
  0xcc   :  { %379 = vst.msk [vmem:[#allocation2] sm:$0xff] %vm378_vm1, %v220_v41  ;;  %395 = vst.msk [vmem:[#allocation2 + $0x80] sm:$0xff] %vm378_vm1, %v300_v42  ;;  %v235_v45 = vadd.f32 %v503_v43, %v735_v34  ;;  %v315_v46 = vadd.f32 %v527_v44, %v735_v34 }
  0xcd   :  { %v229_v47 = vpop.f32.mrf.mxu0  ;;  %v309_v48 = vpop.f32.mrf.mxu1 }
  0xce   :  { %382 = vst.msk [vmem:[#allocation2 + $0x18] sm:$0xff] %vm378_vm1, %v235_v45  ;;  %398 = vst.msk [vmem:[#allocation2 + $0x98] sm:$0xff] %vm378_vm1, %v315_v46  ;;  %v230_v49 = vadd.f32 %v735_v34, %v229_v47  ;;  %v310_v50 = vadd.f32 %v735_v34, %v309_v48 }
  0xcf   :  { %v506_v51 = vpop.f32.mrf.mxu0  ;;  %v530_v52 = vpop.f32.mrf.mxu1 }
  0xd0   :  { %381 = vst.msk [vmem:[#allocation2 + $0x10] sm:$0xff] %vm378_vm1, %v230_v49  ;;  %397 = vst.msk [vmem:[#allocation2 + $0x90] sm:$0xff] %vm378_vm1, %v310_v50  ;;  %v245_v53 = vadd.f32 %v506_v51, %v735_v34  ;;  %v325_v54 = vadd.f32 %v530_v52, %v735_v34 }
  0xd1   :  { %v239_v55 = vpop.f32.mrf.mxu0  ;;  %v319_v56 = vpop.f32.mrf.mxu1 }
  0xd2   :  { %384 = vst.msk [vmem:[#allocation2 + $0x28] sm:$0xff] %vm378_vm1, %v245_v53  ;;  %400 = vst.msk [vmem:[#allocation2 + $0xa8] sm:$0xff] %vm378_vm1, %v325_v54  ;;  %v240_v57 = vadd.f32 %v735_v34, %v239_v55  ;;  %v320_v58 = vadd.f32 %v735_v34, %v319_v56 }
  0xd3   :  { %v509_v59 = vpop.f32.mrf.mxu0  ;;  %v533_v60 = vpop.f32.mrf.mxu1 }
  0xd4   :  { %383 = vst.msk [vmem:[#allocation2 + $0x20] sm:$0xff] %vm378_vm1, %v240_v57  ;;  %399 = vst.msk [vmem:[#allocation2 + $0xa0] sm:$0xff] %vm378_vm1, %v320_v58  ;;  %v255_v61 = vadd.f32 %v509_v59, %v735_v34  ;;  %v335_v62 = vadd.f32 %v533_v60, %v735_v34 }
  0xd5   :  { %v249_v63 = vpop.f32.mrf.mxu0  ;;  %v329_v0 = vpop.f32.mrf.mxu1 }
  0xd6   :  { %386 = vst.msk [vmem:[#allocation2 + $0x38] sm:$0xff] %vm378_vm1, %v255_v61  ;;  %402 = vst.msk [vmem:[#allocation2 + $0xb8] sm:$0xff] %vm378_vm1, %v335_v62  ;;  %v250_v1 = vadd.f32 %v735_v34, %v249_v63  ;;  %v330_v2 = vadd.f32 %v735_v34, %v329_v0 }
  0xd7   :  { %v512_v3 = vpop.f32.mrf.mxu0  ;;  %v536_v4 = vpop.f32.mrf.mxu1 }
  0xd8   :  { %385 = vst.msk [vmem:[#allocation2 + $0x30] sm:$0xff] %vm378_vm1, %v250_v1  ;;  %401 = vst.msk [vmem:[#allocation2 + $0xb0] sm:$0xff] %vm378_vm1, %v330_v2  ;;  %v265_v5 = vadd.f32 %v512_v3, %v735_v34  ;;  %v345_v6 = vadd.f32 %v536_v4, %v735_v34 }
  0xd9   :  { %v259_v7 = vpop.f32.mrf.mxu0  ;;  %v339_v8 = vpop.f32.mrf.mxu1 }
  0xda   :  { %388 = vst.msk [vmem:[#allocation2 + $0x48] sm:$0xff] %vm378_vm1, %v265_v5  ;;  %404 = vst.msk [vmem:[#allocation2 + $0xc8] sm:$0xff] %vm378_vm1, %v345_v6  ;;  %v260_v9 = vadd.f32 %v735_v34, %v259_v7  ;;  %v340_v10 = vadd.f32 %v735_v34, %v339_v8 }
  0xdb   :  { %v515_v11 = vpop.f32.mrf.mxu0  ;;  %v539_v12 = vpop.f32.mrf.mxu1 }
  0xdc   :  { %387 = vst.msk [vmem:[#allocation2 + $0x40] sm:$0xff] %vm378_vm1, %v260_v9  ;;  %403 = vst.msk [vmem:[#allocation2 + $0xc0] sm:$0xff] %vm378_vm1, %v340_v10  ;;  %v275_v13 = vadd.f32 %v515_v11, %v735_v34  ;;  %v355_v14 = vadd.f32 %v539_v12, %v735_v34 }
  0xdd   :  { %v269_v15 = vpop.f32.mrf.mxu0  ;;  %v349_v16 = vpop.f32.mrf.mxu1 }
  0xde   :  { %390 = vst.msk [vmem:[#allocation2 + $0x58] sm:$0xff] %vm378_vm1, %v275_v13  ;;  %406 = vst.msk [vmem:[#allocation2 + $0xd8] sm:$0xff] %vm378_vm1, %v355_v14  ;;  %v270_v17 = vadd.f32 %v735_v34, %v269_v15  ;;  %v350_v18 = vadd.f32 %v735_v34, %v349_v16 }
  0xdf   :  { %v518_v19 = vpop.f32.mrf.mxu0  ;;  %v542_v20 = vpop.f32.mrf.mxu1 }
  0xe0   :  { %389 = vst.msk [vmem:[#allocation2 + $0x50] sm:$0xff] %vm378_vm1, %v270_v17  ;;  %405 = vst.msk [vmem:[#allocation2 + $0xd0] sm:$0xff] %vm378_vm1, %v350_v18  ;;  %v285_v21 = vadd.f32 %v518_v19, %v735_v34  ;;  %v365_v22 = vadd.f32 %v542_v20, %v735_v34 }
  0xe1   :  { %v279_v23 = vpop.f32.mrf.mxu0  ;;  %v359_v24 = vpop.f32.mrf.mxu1 }
  0xe2   :  { %392 = vst.msk [vmem:[#allocation2 + $0x68] sm:$0xff] %vm378_vm1, %v285_v21  ;;  %408 = vst.msk [vmem:[#allocation2 + $0xe8] sm:$0xff] %vm378_vm1, %v365_v22  ;;  %v280_v25 = vadd.f32 %v735_v34, %v279_v23  ;;  %v360_v26 = vadd.f32 %v735_v34, %v359_v24 }
  0xe3   :  { %v521_v27 = vpop.f32.mrf.mxu0  ;;  %v545_v28 = vpop.f32.mrf.mxu1 }
  0xe4   :  { %391 = vst.msk [vmem:[#allocation2 + $0x60] sm:$0xff] %vm378_vm1, %v280_v25  ;;  %407 = vst.msk [vmem:[#allocation2 + $0xe0] sm:$0xff] %vm378_vm1, %v360_v26  ;;  %v295_v29 = vadd.f32 %v521_v27, %v735_v34  ;;  %v375_v30 = vadd.f32 %v545_v28, %v735_v34 }
  0xe5   :  { %v289_v31 = vpop.f32.mrf.mxu0  ;;  %v369_v32 = vpop.f32.mrf.mxu1 }
  0xe6   :  { %394 = vst.msk [vmem:[#allocation2 + $0x78] sm:$0xff] %vm378_vm1, %v295_v29  ;;  %410 = vst.msk [vmem:[#allocation2 + $0xf8] sm:$0xff] %vm378_vm1, %v375_v30  ;;  %v290_v33 = vadd.f32 %v735_v34, %v289_v31  ;;  %v370_v35 = vadd.f32 %v735_v34, %v369_v32 }
  0xe8   :  { %393 = vst.msk [vmem:[#allocation2 + $0x70] sm:$0xff] %vm378_vm1, %v290_v33  ;;  %409 = vst.msk [vmem:[#allocation2 + $0xf0] sm:$0xff] %vm378_vm1, %v370_v35 }
  0xe9   :  { %564 = shalt.err (!%p561_p4)
}
  0xea   :  { %s576_s26 = smov 128   ;;  %s577_s27 = smov 8  }
  0xeb   :  { %422 = dma.vmem_to_hbm [thread:$0]  %s417_s2, 4096, %s807_s3, [#allocation3], %s576_s26, %s576_s26, %s577_s27  }
  0xec   :  { %573 = dma.done.wait [#allocation3], 4096  }
  0xed   :  { %574 = vsyncadd [#allocation3], 4294963200 }
  0xee   :  { %426 = vsyncpa [#allocation3], 1 }

</bundles_post_ra>
